<compile_context>
chip_gen: v5e
topology: v5e:2x2
jax: 0.10.0
libtpu: 0.0.40
codegen_flags: <defaults>
</compile_context>

<pallas_src>
import jax
import jax.numpy as jnp
from jax.experimental import pallas as pl
from jax.experimental.pallas import tpu as pltpu


def _upscale_kernel(x_ref, u_ref, wl_ref, bl_ref, o_ref):
    # x_ref : (1, Cin, TH, W)     u_ref : (W, 2W)   lane-doubling matrix
    # wl_ref: (2*Co*Cin, 2W)      bl_ref: (Co, 4W)  bias lane rows
    # o_ref : (1, Co, TH, 4W)
    cin = x_ref.shape[1]
    n_co = o_ref.shape[1]

    u = u_ref[...]
    # xd[ci][t, 2w+kw] = x[ci, t, w]   (exact MXU copy-expansion, MXU is idle)
    xd = [
        jnp.dot(x_ref[0, ci].astype(jnp.float32), u,
                preferred_element_type=jnp.float32)
        for ci in range(cin)
    ]

    for co in range(n_co):
        halves = []
        for kh in range(2):
            base = (kh * n_co + co) * cin
            # wl[base + ci, 2w+kw] = W[ci, co, kh, kw]  (lane-parity pattern)
            acc = xd[0] * wl_ref[base:base + 1, :]
            for ci in range(1, cin):
                acc = acc + xd[ci] * wl_ref[base + ci:base + ci + 1, :]
            halves.append(acc)
        # [kh=0 row | kh=1 row] -> one contiguous 4W lane row of the output.
        row = jnp.concatenate(halves, axis=-1) + bl_ref[co:co + 1, :]
        o_ref[0, co] = jnp.maximum(row, 0.0).astype(o_ref.dtype)


def upscale_block_forward(x, weight, bias, *, target_block_bytes=4 << 20):
    """ConvTranspose2d(k=2, s=2, p=0) + ReLU, NCHW.

    x: (N, Cin, H, W), weight: (Cin, Co, 2, 2) (PyTorch layout), bias: (Co,).
    Returns (N, Co, 2H, 2W).
    """
    N, Cin, H, W = x.shape
    w_cin, Co, KH, KW = weight.shape
    assert w_cin == Cin and KH == 2 and KW == 2

    # ---- row-strip (TH) tile selection -------------------------------------
    itemsize = jnp.dtype(x.dtype).itemsize
    out_bytes_per_row = Co * 4 * W * itemsize          # output bytes per input row
    th = max(1, int(target_block_bytes) // max(1, out_bytes_per_row))
    if N == 1:
        # keep >= 2 parallel grid steps so both v7x TensorCores get work
        th = min(th, max(1, H // 2))
    if th >= H:
        th = H                       # full-extent block: always legal
    else:
        th = max(8, (th // 8) * 8)   # second-minor block dim must be mult of 8
    n_h = pl.cdiv(H, th)
    # TODO(synk): also tile W for extremely wide images where Co*TH*4W blocks
    # would overflow scoped VMEM; typical autoencoder shapes never hit this.

    f32 = jnp.float32
    # Lane-doubling matrix U[w, 2w+kw] = 1.
    u = (jnp.arange(2 * W, dtype=jnp.int32)[None, :] // 2
         == jnp.arange(W, dtype=jnp.int32)[:, None]).astype(f32)
    # Lane-parity weight rows wl[(kh*Co+co)*Cin + ci, 2w+kw] = weight[ci,co,kh,kw]
    wt = jnp.transpose(weight.astype(f32), (2, 1, 0, 3))        # (2, Co, Cin, 2)
    wl = jnp.broadcast_to(wt[:, :, :, None, :], (2, Co, Cin, W, 2))
    wl = wl.reshape(2 * Co * Cin, 2 * W)
    # Bias as (Co, 4W) lane rows.
    bl = jnp.broadcast_to(bias.astype(f32)[:, None], (Co, 4 * W))

    out4 = pl.pallas_call(
        _upscale_kernel,
        out_shape=jax.ShapeDtypeStruct((N, Co, H, 4 * W), x.dtype),
        grid=(N, n_h),
        in_specs=[
            pl.BlockSpec((1, Cin, th, W), lambda n, h: (n, 0, h, 0)),
            pl.BlockSpec((W, 2 * W), lambda n, h: (0, 0)),
            pl.BlockSpec((2 * Co * Cin, 2 * W), lambda n, h: (0, 0)),
            pl.BlockSpec((Co, 4 * W), lambda n, h: (0, 0)),
        ],
        out_specs=pl.BlockSpec((1, Co, th, 4 * W), lambda n, h: (n, 0, h, 0)),
        compiler_params=pltpu.CompilerParams(
            dimension_semantics=("parallel", "parallel")),
    )(x, u, wl, bl)

    # (N, Co, H, 4W) -> (N, Co, 2H, 2W): pure adjacent-dim split/merge -> free.
    return out4.reshape(N, Co, 2 * H, 2 * W)


def _reference(x, weight, bias):
    # Pure-JAX reference of ConvTranspose2d(k=2, s=2, p=0) + ReLU, NCHW.
    y = jnp.einsum("nihw,iokl->nohwkl", x, weight,
                   precision=jax.lax.Precision.HIGHEST)
    y = y + bias[None, :, None, None, None, None]
    N, Co, H, W, _, _ = y.shape
    y = jnp.transpose(y, (0, 1, 2, 4, 3, 5)).reshape(N, Co, 2 * H, 2 * W)
    return jnp.maximum(y, 0.0)


if __name__ == "__main__":
    N, Cin, Co, H, W = 2, 4, 8, 16, 16

    key = jax.random.PRNGKey(0)
    kx, kwt, kb = jax.random.split(key, 3)
    x = jax.random.normal(kx, (N, Cin, H, W), dtype=jnp.float32)
    # ConvTranspose2d parameters: weight (in, out, kH, kW), bias (out,)
    weight = 0.1 * jax.random.normal(kwt, (Cin, Co, 2, 2), dtype=jnp.float32)
    bias = 0.1 * jax.random.normal(kb, (Co,), dtype=jnp.float32)

    fwd = jax.jit(upscale_block_forward)
    out = jax.block_until_ready(fwd(x, weight, bias))

    ref = _reference(x, weight, bias)
    assert out.shape == (N, Co, 2 * H, 2 * W)
    err = float(jnp.abs(out - ref).max())
    assert jnp.allclose(out, ref, atol=1e-5, rtol=1e-5), err

    print("KERNEL_OK")
</pallas_src>

<mosaic_0001>
module attributes {stable_mosaic.version = 11 : i64} {
  func.func @_upscale_kernel(%arg0: i32, %arg1: i32, %arg2: memref<1x4x16x16xf32, #tpu.memory_space<vmem>>, %arg3: memref<16x32xf32, #tpu.memory_space<vmem>>, %arg4: memref<64x32xf32, #tpu.memory_space<vmem>>, %arg5: memref<8x64xf32, #tpu.memory_space<vmem>>, %arg6: memref<1x8x16x64xf32, #tpu.memory_space<vmem>>) attributes {dimension_semantics = [#tpu.dimension_semantics<parallel>, #tpu.dimension_semantics<parallel>], iteration_bounds = array<i64: 2, 1>, scalar_prefetch = 0 : i64, scratch_operands = 0 : i64, tpu.core_type = #tpu.core_type<tc>, window_params = [{transform_indices = @transform_0, window_bounds = array<i64: 1, 4, 16, 16>}, {pipeline_mode = #tpu.pipeline_mode<synchronous>, transform_indices = @transform_1, window_bounds = array<i64: 16, 32>}, {pipeline_mode = #tpu.pipeline_mode<synchronous>, transform_indices = @transform_2, window_bounds = array<i64: 64, 32>}, {pipeline_mode = #tpu.pipeline_mode<synchronous>, transform_indices = @transform_3, window_bounds = array<i64: 8, 64>}, {transform_indices = @transform_4, window_bounds = array<i64: 1, 8, 16, 64>}]} {
    %c0 = arith.constant 0 : index
    %c0_0 = arith.constant 0 : index
    %0 = vector.load %arg3[%c0, %c0_0] : memref<16x32xf32, #tpu.memory_space<vmem>>, vector<16x32xf32>
    %c0_1 = arith.constant 0 : index
    %c0_2 = arith.constant 0 : index
    %c0_3 = arith.constant 0 : index
    %c0_4 = arith.constant 0 : index
    %1 = vector.load %arg2[%c0_1, %c0_2, %c0_3, %c0_4] : memref<1x4x16x16xf32, #tpu.memory_space<vmem>>, vector<1x1x16x16xf32>
    %2 = vector.shape_cast %1 : vector<1x1x16x16xf32> to vector<16x16xf32>
    %cst = arith.constant dense<0.000000e+00> : vector<16x32xf32>
    %3 = tpu.matmul %2, %0, %cst {dimension_numbers = #tpu.dot_dimension_numbers<[1], [0], [0], [1], [0, 0, 1, 1], [], []>} : vector<16x16xf32>, vector<16x32xf32>, vector<16x32xf32> -> vector<16x32xf32>
    %c0_5 = arith.constant 0 : index
    %c1 = arith.constant 1 : index
    %c0_6 = arith.constant 0 : index
    %c0_7 = arith.constant 0 : index
    %4 = vector.load %arg2[%c0_5, %c1, %c0_6, %c0_7] : memref<1x4x16x16xf32, #tpu.memory_space<vmem>>, vector<1x1x16x16xf32>
    %5 = vector.shape_cast %4 : vector<1x1x16x16xf32> to vector<16x16xf32>
    %cst_8 = arith.constant dense<0.000000e+00> : vector<16x32xf32>
    %6 = tpu.matmul %5, %0, %cst_8 {dimension_numbers = #tpu.dot_dimension_numbers<[1], [0], [0], [1], [0, 0, 1, 1], [], []>} : vector<16x16xf32>, vector<16x32xf32>, vector<16x32xf32> -> vector<16x32xf32>
    %c0_9 = arith.constant 0 : index
    %c2 = arith.constant 2 : index
    %c0_10 = arith.constant 0 : index
    %c0_11 = arith.constant 0 : index
    %7 = vector.load %arg2[%c0_9, %c2, %c0_10, %c0_11] : memref<1x4x16x16xf32, #tpu.memory_space<vmem>>, vector<1x1x16x16xf32>
    %8 = vector.shape_cast %7 : vector<1x1x16x16xf32> to vector<16x16xf32>
    %cst_12 = arith.constant dense<0.000000e+00> : vector<16x32xf32>
    %9 = tpu.matmul %8, %0, %cst_12 {dimension_numbers = #tpu.dot_dimension_numbers<[1], [0], [0], [1], [0, 0, 1, 1], [], []>} : vector<16x16xf32>, vector<16x32xf32>, vector<16x32xf32> -> vector<16x32xf32>
    %c0_13 = arith.constant 0 : index
    %c3 = arith.constant 3 : index
    %c0_14 = arith.constant 0 : index
    %c0_15 = arith.constant 0 : index
    %10 = vector.load %arg2[%c0_13, %c3, %c0_14, %c0_15] : memref<1x4x16x16xf32, #tpu.memory_space<vmem>>, vector<1x1x16x16xf32>
    %11 = vector.shape_cast %10 : vector<1x1x16x16xf32> to vector<16x16xf32>
    %cst_16 = arith.constant dense<0.000000e+00> : vector<16x32xf32>
    %12 = tpu.matmul %11, %0, %cst_16 {dimension_numbers = #tpu.dot_dimension_numbers<[1], [0], [0], [1], [0, 0, 1, 1], [], []>} : vector<16x16xf32>, vector<16x32xf32>, vector<16x32xf32> -> vector<16x32xf32>
    %c0_17 = arith.constant 0 : index
    %c0_18 = arith.constant 0 : index
    %13 = vector.load %arg4[%c0_17, %c0_18] : memref<64x32xf32, #tpu.memory_space<vmem>>, vector<1x32xf32>
    %14 = vector.broadcast %13 : vector<1x32xf32> to vector<16x32xf32>
    %15 = arith.mulf %3, %14 : vector<16x32xf32>
    %c1_19 = arith.constant 1 : index
    %c0_20 = arith.constant 0 : index
    %16 = vector.load %arg4[%c1_19, %c0_20] : memref<64x32xf32, #tpu.memory_space<vmem>>, vector<1x32xf32>
    %17 = vector.broadcast %16 : vector<1x32xf32> to vector<16x32xf32>
    %18 = arith.mulf %6, %17 : vector<16x32xf32>
    %19 = arith.addf %15, %18 : vector<16x32xf32>
    %c2_21 = arith.constant 2 : index
    %c0_22 = arith.constant 0 : index
    %20 = vector.load %arg4[%c2_21, %c0_22] : memref<64x32xf32, #tpu.memory_space<vmem>>, vector<1x32xf32>
    %21 = vector.broadcast %20 : vector<1x32xf32> to vector<16x32xf32>
    %22 = arith.mulf %9, %21 : vector<16x32xf32>
    %23 = arith.addf %19, %22 : vector<16x32xf32>
    %c3_23 = arith.constant 3 : index
    %c0_24 = arith.constant 0 : index
    %24 = vector.load %arg4[%c3_23, %c0_24] : memref<64x32xf32, #tpu.memory_space<vmem>>, vector<1x32xf32>
    %25 = vector.broadcast %24 : vector<1x32xf32> to vector<16x32xf32>
    %26 = arith.mulf %12, %25 : vector<16x32xf32>
    %27 = arith.addf %23, %26 : vector<16x32xf32>
    %c32 = arith.constant 32 : index
    %c0_25 = arith.constant 0 : index
    %28 = vector.load %arg4[%c32, %c0_25] : memref<64x32xf32, #tpu.memory_space<vmem>>, vector<1x32xf32>
    %29 = vector.broadcast %28 : vector<1x32xf32> to vector<16x32xf32>
    %30 = arith.mulf %3, %29 : vector<16x32xf32>
    %c33 = arith.constant 33 : index
    %c0_26 = arith.constant 0 : index
    %31 = vector.load %arg4[%c33, %c0_26] : memref<64x32xf32, #tpu.memory_space<vmem>>, vector<1x32xf32>
    %32 = vector.broadcast %31 : vector<1x32xf32> to vector<16x32xf32>
    %33 = arith.mulf %6, %32 : vector<16x32xf32>
    %34 = arith.addf %30, %33 : vector<16x32xf32>
    %c34 = arith.constant 34 : index
    %c0_27 = arith.constant 0 : index
    %35 = vector.load %arg4[%c34, %c0_27] : memref<64x32xf32, #tpu.memory_space<vmem>>, vector<1x32xf32>
    %36 = vector.broadcast %35 : vector<1x32xf32> to vector<16x32xf32>
    %37 = arith.mulf %9, %36 : vector<16x32xf32>
    %38 = arith.addf %34, %37 : vector<16x32xf32>
    %c35 = arith.constant 35 : index
    %c0_28 = arith.constant 0 : index
    %39 = vector.load %arg4[%c35, %c0_28] : memref<64x32xf32, #tpu.memory_space<vmem>>, vector<1x32xf32>
    %40 = vector.broadcast %39 : vector<1x32xf32> to vector<16x32xf32>
    %41 = arith.mulf %12, %40 : vector<16x32xf32>
    %42 = arith.addf %38, %41 : vector<16x32xf32>
    %43 = tpu.concatenate %27, %42 in 1 : vector<16x32xf32>, vector<16x32xf32> -> vector<16x64xf32>
    %c0_29 = arith.constant 0 : index
    %c0_30 = arith.constant 0 : index
    %44 = vector.load %arg5[%c0_29, %c0_30] : memref<8x64xf32, #tpu.memory_space<vmem>>, vector<1x64xf32>
    %45 = vector.broadcast %44 : vector<1x64xf32> to vector<16x64xf32>
    %46 = arith.addf %43, %45 : vector<16x64xf32>
    %cst_31 = arith.constant 0.000000e+00 : f32
    %47 = vector.broadcast %cst_31 : f32 to vector<16x64xf32>
    %48 = arith.maximumf %46, %47 : vector<16x64xf32>
    %c0_32 = arith.constant 0 : index
    %c0_33 = arith.constant 0 : index
    %c0_34 = arith.constant 0 : index
    %c0_35 = arith.constant 0 : index
    %49 = vector.load %arg6[%c0_32, %c0_33, %c0_34, %c0_35] : memref<1x8x16x64xf32, #tpu.memory_space<vmem>>, vector<1x1x16x64xf32>
    %50 = vector.shape_cast %49 : vector<1x1x16x64xf32> to vector<16x64xf32>
    %51 = vector.shape_cast %48 : vector<16x64xf32> to vector<1x1x16x64xf32>
    tpu.vector_store %arg6[%c0_32, %c0_33, %c0_34, %c0_35], %51 {strides = array<i32>} : memref<1x8x16x64xf32, #tpu.memory_space<vmem>>, vector<1x1x16x64xf32>,
    %c4 = arith.constant 4 : index
    %c0_36 = arith.constant 0 : index
    %52 = vector.load %arg4[%c4, %c0_36] : memref<64x32xf32, #tpu.memory_space<vmem>>, vector<1x32xf32>
    %53 = vector.broadcast %52 : vector<1x32xf32> to vector<16x32xf32>
    %54 = arith.mulf %3, %53 : vector<16x32xf32>
    %c5 = arith.constant 5 : index
    %c0_37 = arith.constant 0 : index
    %55 = vector.load %arg4[%c5, %c0_37] : memref<64x32xf32, #tpu.memory_space<vmem>>, vector<1x32xf32>
    %56 = vector.broadcast %55 : vector<1x32xf32> to vector<16x32xf32>
    %57 = arith.mulf %6, %56 : vector<16x32xf32>
    %58 = arith.addf %54, %57 : vector<16x32xf32>
    %c6 = arith.constant 6 : index
    %c0_38 = arith.constant 0 : index
    %59 = vector.load %arg4[%c6, %c0_38] : memref<64x32xf32, #tpu.memory_space<vmem>>, vector<1x32xf32>
    %60 = vector.broadcast %59 : vector<1x32xf32> to vector<16x32xf32>
    %61 = arith.mulf %9, %60 : vector<16x32xf32>
    %62 = arith.addf %58, %61 : vector<16x32xf32>
    %c7 = arith.constant 7 : index
    %c0_39 = arith.constant 0 : index
    %63 = vector.load %arg4[%c7, %c0_39] : memref<64x32xf32, #tpu.memory_space<vmem>>, vector<1x32xf32>
    %64 = vector.broadcast %63 : vector<1x32xf32> to vector<16x32xf32>
    %65 = arith.mulf %12, %64 : vector<16x32xf32>
    %66 = arith.addf %62, %65 : vector<16x32xf32>
    %c36 = arith.constant 36 : index
    %c0_40 = arith.constant 0 : index
    %67 = vector.load %arg4[%c36, %c0_40] : memref<64x32xf32, #tpu.memory_space<vmem>>, vector<1x32xf32>
    %68 = vector.broadcast %67 : vector<1x32xf32> to vector<16x32xf32>
    %69 = arith.mulf %3, %68 : vector<16x32xf32>
    %c37 = arith.constant 37 : index
    %c0_41 = arith.constant 0 : index
    %70 = vector.load %arg4[%c37, %c0_41] : memref<64x32xf32, #tpu.memory_space<vmem>>, vector<1x32xf32>
    %71 = vector.broadcast %70 : vector<1x32xf32> to vector<16x32xf32>
    %72 = arith.mulf %6, %71 : vector<16x32xf32>
    %73 = arith.addf %69, %72 : vector<16x32xf32>
    %c38 = arith.constant 38 : index
    %c0_42 = arith.constant 0 : index
    %74 = vector.load %arg4[%c38, %c0_42] : memref<64x32xf32, #tpu.memory_space<vmem>>, vector<1x32xf32>
    %75 = vector.broadcast %74 : vector<1x32xf32> to vector<16x32xf32>
    %76 = arith.mulf %9, %75 : vector<16x32xf32>
    %77 = arith.addf %73, %76 : vector<16x32xf32>
    %c39 = arith.constant 39 : index
    %c0_43 = arith.constant 0 : index
    %78 = vector.load %arg4[%c39, %c0_43] : memref<64x32xf32, #tpu.memory_space<vmem>>, vector<1x32xf32>
    %79 = vector.broadcast %78 : vector<1x32xf32> to vector<16x32xf32>
    %80 = arith.mulf %12, %79 : vector<16x32xf32>
    %81 = arith.addf %77, %80 : vector<16x32xf32>
    %82 = tpu.concatenate %66, %81 in 1 : vector<16x32xf32>, vector<16x32xf32> -> vector<16x64xf32>
    %c1_44 = arith.constant 1 : index
    %c0_45 = arith.constant 0 : index
    %83 = vector.load %arg5[%c1_44, %c0_45] : memref<8x64xf32, #tpu.memory_space<vmem>>, vector<1x64xf32>
    %84 = vector.broadcast %83 : vector<1x64xf32> to vector<16x64xf32>
    %85 = arith.addf %82, %84 : vector<16x64xf32>
    %cst_46 = arith.constant 0.000000e+00 : f32
    %86 = vector.broadcast %cst_46 : f32 to vector<16x64xf32>
    %87 = arith.maximumf %85, %86 : vector<16x64xf32>
    %c0_47 = arith.constant 0 : index
    %c1_48 = arith.constant 1 : index
    %c0_49 = arith.constant 0 : index
    %c0_50 = arith.constant 0 : index
    %88 = vector.load %arg6[%c0_47, %c1_48, %c0_49, %c0_50] : memref<1x8x16x64xf32, #tpu.memory_space<vmem>>, vector<1x1x16x64xf32>
    %89 = vector.shape_cast %88 : vector<1x1x16x64xf32> to vector<16x64xf32>
    %90 = vector.shape_cast %87 : vector<16x64xf32> to vector<1x1x16x64xf32>
    tpu.vector_store %arg6[%c0_47, %c1_48, %c0_49, %c0_50], %90 {strides = array<i32>} : memref<1x8x16x64xf32, #tpu.memory_space<vmem>>, vector<1x1x16x64xf32>,
    %c8 = arith.constant 8 : index
    %c0_51 = arith.constant 0 : index
    %91 = vector.load %arg4[%c8, %c0_51] : memref<64x32xf32, #tpu.memory_space<vmem>>, vector<1x32xf32>
    %92 = vector.broadcast %91 : vector<1x32xf32> to vector<16x32xf32>
    %93 = arith.mulf %3, %92 : vector<16x32xf32>
    %c9 = arith.constant 9 : index
    %c0_52 = arith.constant 0 : index
    %94 = vector.load %arg4[%c9, %c0_52] : memref<64x32xf32, #tpu.memory_space<vmem>>, vector<1x32xf32>
    %95 = vector.broadcast %94 : vector<1x32xf32> to vector<16x32xf32>
    %96 = arith.mulf %6, %95 : vector<16x32xf32>
    %97 = arith.addf %93, %96 : vector<16x32xf32>
    %c10 = arith.constant 10 : index
    %c0_53 = arith.constant 0 : index
    %98 = vector.load %arg4[%c10, %c0_53] : memref<64x32xf32, #tpu.memory_space<vmem>>, vector<1x32xf32>
    %99 = vector.broadcast %98 : vector<1x32xf32> to vector<16x32xf32>
    %100 = arith.mulf %9, %99 : vector<16x32xf32>
    %101 = arith.addf %97, %100 : vector<16x32xf32>
    %c11 = arith.constant 11 : index
    %c0_54 = arith.constant 0 : index
    %102 = vector.load %arg4[%c11, %c0_54] : memref<64x32xf32, #tpu.memory_space<vmem>>, vector<1x32xf32>
    %103 = vector.broadcast %102 : vector<1x32xf32> to vector<16x32xf32>
    %104 = arith.mulf %12, %103 : vector<16x32xf32>
    %105 = arith.addf %101, %104 : vector<16x32xf32>
    %c40 = arith.constant 40 : index
    %c0_55 = arith.constant 0 : index
    %106 = vector.load %arg4[%c40, %c0_55] : memref<64x32xf32, #tpu.memory_space<vmem>>, vector<1x32xf32>
    %107 = vector.broadcast %106 : vector<1x32xf32> to vector<16x32xf32>
    %108 = arith.mulf %3, %107 : vector<16x32xf32>
    %c41 = arith.constant 41 : index
    %c0_56 = arith.constant 0 : index
    %109 = vector.load %arg4[%c41, %c0_56] : memref<64x32xf32, #tpu.memory_space<vmem>>, vector<1x32xf32>
    %110 = vector.broadcast %109 : vector<1x32xf32> to vector<16x32xf32>
    %111 = arith.mulf %6, %110 : vector<16x32xf32>
    %112 = arith.addf %108, %111 : vector<16x32xf32>
    %c42 = arith.constant 42 : index
    %c0_57 = arith.constant 0 : index
    %113 = vector.load %arg4[%c42, %c0_57] : memref<64x32xf32, #tpu.memory_space<vmem>>, vector<1x32xf32>
    %114 = vector.broadcast %113 : vector<1x32xf32> to vector<16x32xf32>
    %115 = arith.mulf %9, %114 : vector<16x32xf32>
    %116 = arith.addf %112, %115 : vector<16x32xf32>
    %c43 = arith.constant 43 : index
    %c0_58 = arith.constant 0 : index
    %117 = vector.load %arg4[%c43, %c0_58] : memref<64x32xf32, #tpu.memory_space<vmem>>, vector<1x32xf32>
    %118 = vector.broadcast %117 : vector<1x32xf32> to vector<16x32xf32>
    %119 = arith.mulf %12, %118 : vector<16x32xf32>
    %120 = arith.addf %116, %119 : vector<16x32xf32>
    %121 = tpu.concatenate %105, %120 in 1 : vector<16x32xf32>, vector<16x32xf32> -> vector<16x64xf32>
    %c2_59 = arith.constant 2 : index
    %c0_60 = arith.constant 0 : index
    %122 = vector.load %arg5[%c2_59, %c0_60] : memref<8x64xf32, #tpu.memory_space<vmem>>, vector<1x64xf32>
    %123 = vector.broadcast %122 : vector<1x64xf32> to vector<16x64xf32>
    %124 = arith.addf %121, %123 : vector<16x64xf32>
    %cst_61 = arith.constant 0.000000e+00 : f32
    %125 = vector.broadcast %cst_61 : f32 to vector<16x64xf32>
    %126 = arith.maximumf %124, %125 : vector<16x64xf32>
    %c0_62 = arith.constant 0 : index
    %c2_63 = arith.constant 2 : index
    %c0_64 = arith.constant 0 : index
    %c0_65 = arith.constant 0 : index
    %127 = vector.load %arg6[%c0_62, %c2_63, %c0_64, %c0_65] : memref<1x8x16x64xf32, #tpu.memory_space<vmem>>, vector<1x1x16x64xf32>
    %128 = vector.shape_cast %127 : vector<1x1x16x64xf32> to vector<16x64xf32>
    %129 = vector.shape_cast %126 : vector<16x64xf32> to vector<1x1x16x64xf32>
    tpu.vector_store %arg6[%c0_62, %c2_63, %c0_64, %c0_65], %129 {strides = array<i32>} : memref<1x8x16x64xf32, #tpu.memory_space<vmem>>, vector<1x1x16x64xf32>,
    %c12 = arith.constant 12 : index
    %c0_66 = arith.constant 0 : index
    %130 = vector.load %arg4[%c12, %c0_66] : memref<64x32xf32, #tpu.memory_space<vmem>>, vector<1x32xf32>
    %131 = vector.broadcast %130 : vector<1x32xf32> to vector<16x32xf32>
    %132 = arith.mulf %3, %131 : vector<16x32xf32>
    %c13 = arith.constant 13 : index
    %c0_67 = arith.constant 0 : index
    %133 = vector.load %arg4[%c13, %c0_67] : memref<64x32xf32, #tpu.memory_space<vmem>>, vector<1x32xf32>
    %134 = vector.broadcast %133 : vector<1x32xf32> to vector<16x32xf32>
    %135 = arith.mulf %6, %134 : vector<16x32xf32>
    %136 = arith.addf %132, %135 : vector<16x32xf32>
    %c14 = arith.constant 14 : index
    %c0_68 = arith.constant 0 : index
    %137 = vector.load %arg4[%c14, %c0_68] : memref<64x32xf32, #tpu.memory_space<vmem>>, vector<1x32xf32>
    %138 = vector.broadcast %137 : vector<1x32xf32> to vector<16x32xf32>
    %139 = arith.mulf %9, %138 : vector<16x32xf32>
    %140 = arith.addf %136, %139 : vector<16x32xf32>
    %c15 = arith.constant 15 : index
    %c0_69 = arith.constant 0 : index
    %141 = vector.load %arg4[%c15, %c0_69] : memref<64x32xf32, #tpu.memory_space<vmem>>, vector<1x32xf32>
    %142 = vector.broadcast %141 : vector<1x32xf32> to vector<16x32xf32>
    %143 = arith.mulf %12, %142 : vector<16x32xf32>
    %144 = arith.addf %140, %143 : vector<16x32xf32>
    %c44 = arith.constant 44 : index
    %c0_70 = arith.constant 0 : index
    %145 = vector.load %arg4[%c44, %c0_70] : memref<64x32xf32, #tpu.memory_space<vmem>>, vector<1x32xf32>
    %146 = vector.broadcast %145 : vector<1x32xf32> to vector<16x32xf32>
    %147 = arith.mulf %3, %146 : vector<16x32xf32>
    %c45 = arith.constant 45 : index
    %c0_71 = arith.constant 0 : index
    %148 = vector.load %arg4[%c45, %c0_71] : memref<64x32xf32, #tpu.memory_space<vmem>>, vector<1x32xf32>
    %149 = vector.broadcast %148 : vector<1x32xf32> to vector<16x32xf32>
    %150 = arith.mulf %6, %149 : vector<16x32xf32>
    %151 = arith.addf %147, %150 : vector<16x32xf32>
    %c46 = arith.constant 46 : index
    %c0_72 = arith.constant 0 : index
    %152 = vector.load %arg4[%c46, %c0_72] : memref<64x32xf32, #tpu.memory_space<vmem>>, vector<1x32xf32>
    %153 = vector.broadcast %152 : vector<1x32xf32> to vector<16x32xf32>
    %154 = arith.mulf %9, %153 : vector<16x32xf32>
    %155 = arith.addf %151, %154 : vector<16x32xf32>
    %c47 = arith.constant 47 : index
    %c0_73 = arith.constant 0 : index
    %156 = vector.load %arg4[%c47, %c0_73] : memref<64x32xf32, #tpu.memory_space<vmem>>, vector<1x32xf32>
    %157 = vector.broadcast %156 : vector<1x32xf32> to vector<16x32xf32>
    %158 = arith.mulf %12, %157 : vector<16x32xf32>
    %159 = arith.addf %155, %158 : vector<16x32xf32>
    %160 = tpu.concatenate %144, %159 in 1 : vector<16x32xf32>, vector<16x32xf32> -> vector<16x64xf32>
    %c3_74 = arith.constant 3 : index
    %c0_75 = arith.constant 0 : index
    %161 = vector.load %arg5[%c3_74, %c0_75] : memref<8x64xf32, #tpu.memory_space<vmem>>, vector<1x64xf32>
    %162 = vector.broadcast %161 : vector<1x64xf32> to vector<16x64xf32>
    %163 = arith.addf %160, %162 : vector<16x64xf32>
    %cst_76 = arith.constant 0.000000e+00 : f32
    %164 = vector.broadcast %cst_76 : f32 to vector<16x64xf32>
    %165 = arith.maximumf %163, %164 : vector<16x64xf32>
    %c0_77 = arith.constant 0 : index
    %c3_78 = arith.constant 3 : index
    %c0_79 = arith.constant 0 : index
    %c0_80 = arith.constant 0 : index
    %166 = vector.load %arg6[%c0_77, %c3_78, %c0_79, %c0_80] : memref<1x8x16x64xf32, #tpu.memory_space<vmem>>, vector<1x1x16x64xf32>
    %167 = vector.shape_cast %166 : vector<1x1x16x64xf32> to vector<16x64xf32>
    %168 = vector.shape_cast %165 : vector<16x64xf32> to vector<1x1x16x64xf32>
    tpu.vector_store %arg6[%c0_77, %c3_78, %c0_79, %c0_80], %168 {strides = array<i32>} : memref<1x8x16x64xf32, #tpu.memory_space<vmem>>, vector<1x1x16x64xf32>,
    %c16 = arith.constant 16 : index
    %c0_81 = arith.constant 0 : index
    %169 = vector.load %arg4[%c16, %c0_81] : memref<64x32xf32, #tpu.memory_space<vmem>>, vector<1x32xf32>
    %170 = vector.broadcast %169 : vector<1x32xf32> to vector<16x32xf32>
    %171 = arith.mulf %3, %170 : vector<16x32xf32>
    %c17 = arith.constant 17 : index
    %c0_82 = arith.constant 0 : index
    %172 = vector.load %arg4[%c17, %c0_82] : memref<64x32xf32, #tpu.memory_space<vmem>>, vector<1x32xf32>
    %173 = vector.broadcast %172 : vector<1x32xf32> to vector<16x32xf32>
    %174 = arith.mulf %6, %173 : vector<16x32xf32>
    %175 = arith.addf %171, %174 : vector<16x32xf32>
    %c18 = arith.constant 18 : index
    %c0_83 = arith.constant 0 : index
    %176 = vector.load %arg4[%c18, %c0_83] : memref<64x32xf32, #tpu.memory_space<vmem>>, vector<1x32xf32>
    %177 = vector.broadcast %176 : vector<1x32xf32> to vector<16x32xf32>
    %178 = arith.mulf %9, %177 : vector<16x32xf32>
    %179 = arith.addf %175, %178 : vector<16x32xf32>
    %c19 = arith.constant 19 : index
    %c0_84 = arith.constant 0 : index
    %180 = vector.load %arg4[%c19, %c0_84] : memref<64x32xf32, #tpu.memory_space<vmem>>, vector<1x32xf32>
    %181 = vector.broadcast %180 : vector<1x32xf32> to vector<16x32xf32>
    %182 = arith.mulf %12, %181 : vector<16x32xf32>
    %183 = arith.addf %179, %182 : vector<16x32xf32>
    %c48 = arith.constant 48 : index
    %c0_85 = arith.constant 0 : index
    %184 = vector.load %arg4[%c48, %c0_85] : memref<64x32xf32, #tpu.memory_space<vmem>>, vector<1x32xf32>
    %185 = vector.broadcast %184 : vector<1x32xf32> to vector<16x32xf32>
    %186 = arith.mulf %3, %185 : vector<16x32xf32>
    %c49 = arith.constant 49 : index
    %c0_86 = arith.constant 0 : index
    %187 = vector.load %arg4[%c49, %c0_86] : memref<64x32xf32, #tpu.memory_space<vmem>>, vector<1x32xf32>
    %188 = vector.broadcast %187 : vector<1x32xf32> to vector<16x32xf32>
    %189 = arith.mulf %6, %188 : vector<16x32xf32>
    %190 = arith.addf %186, %189 : vector<16x32xf32>
    %c50 = arith.constant 50 : index
    %c0_87 = arith.constant 0 : index
    %191 = vector.load %arg4[%c50, %c0_87] : memref<64x32xf32, #tpu.memory_space<vmem>>, vector<1x32xf32>
    %192 = vector.broadcast %191 : vector<1x32xf32> to vector<16x32xf32>
    %193 = arith.mulf %9, %192 : vector<16x32xf32>
    %194 = arith.addf %190, %193 : vector<16x32xf32>
    %c51 = arith.constant 51 : index
    %c0_88 = arith.constant 0 : index
    %195 = vector.load %arg4[%c51, %c0_88] : memref<64x32xf32, #tpu.memory_space<vmem>>, vector<1x32xf32>
    %196 = vector.broadcast %195 : vector<1x32xf32> to vector<16x32xf32>
    %197 = arith.mulf %12, %196 : vector<16x32xf32>
    %198 = arith.addf %194, %197 : vector<16x32xf32>
    %199 = tpu.concatenate %183, %198 in 1 : vector<16x32xf32>, vector<16x32xf32> -> vector<16x64xf32>
    %c4_89 = arith.constant 4 : index
    %c0_90 = arith.constant 0 : index
    %200 = vector.load %arg5[%c4_89, %c0_90] : memref<8x64xf32, #tpu.memory_space<vmem>>, vector<1x64xf32>
    %201 = vector.broadcast %200 : vector<1x64xf32> to vector<16x64xf32>
    %202 = arith.addf %199, %201 : vector<16x64xf32>
    %cst_91 = arith.constant 0.000000e+00 : f32
    %203 = vector.broadcast %cst_91 : f32 to vector<16x64xf32>
    %204 = arith.maximumf %202, %203 : vector<16x64xf32>
    %c0_92 = arith.constant 0 : index
    %c4_93 = arith.constant 4 : index
    %c0_94 = arith.constant 0 : index
    %c0_95 = arith.constant 0 : index
    %205 = vector.load %arg6[%c0_92, %c4_93, %c0_94, %c0_95] : memref<1x8x16x64xf32, #tpu.memory_space<vmem>>, vector<1x1x16x64xf32>
    %206 = vector.shape_cast %205 : vector<1x1x16x64xf32> to vector<16x64xf32>
    %207 = vector.shape_cast %204 : vector<16x64xf32> to vector<1x1x16x64xf32>
    tpu.vector_store %arg6[%c0_92, %c4_93, %c0_94, %c0_95], %207 {strides = array<i32>} : memref<1x8x16x64xf32, #tpu.memory_space<vmem>>, vector<1x1x16x64xf32>,
    %c20 = arith.constant 20 : index
    %c0_96 = arith.constant 0 : index
    %208 = vector.load %arg4[%c20, %c0_96] : memref<64x32xf32, #tpu.memory_space<vmem>>, vector<1x32xf32>
    %209 = vector.broadcast %208 : vector<1x32xf32> to vector<16x32xf32>
    %210 = arith.mulf %3, %209 : vector<16x32xf32>
    %c21 = arith.constant 21 : index
    %c0_97 = arith.constant 0 : index
    %211 = vector.load %arg4[%c21, %c0_97] : memref<64x32xf32, #tpu.memory_space<vmem>>, vector<1x32xf32>
    %212 = vector.broadcast %211 : vector<1x32xf32> to vector<16x32xf32>
    %213 = arith.mulf %6, %212 : vector<16x32xf32>
    %214 = arith.addf %210, %213 : vector<16x32xf32>
    %c22 = arith.constant 22 : index
    %c0_98 = arith.constant 0 : index
    %215 = vector.load %arg4[%c22, %c0_98] : memref<64x32xf32, #tpu.memory_space<vmem>>, vector<1x32xf32>
    %216 = vector.broadcast %215 : vector<1x32xf32> to vector<16x32xf32>
    %217 = arith.mulf %9, %216 : vector<16x32xf32>
    %218 = arith.addf %214, %217 : vector<16x32xf32>
    %c23 = arith.constant 23 : index
    %c0_99 = arith.constant 0 : index
    %219 = vector.load %arg4[%c23, %c0_99] : memref<64x32xf32, #tpu.memory_space<vmem>>, vector<1x32xf32>
    %220 = vector.broadcast %219 : vector<1x32xf32> to vector<16x32xf32>
    %221 = arith.mulf %12, %220 : vector<16x32xf32>
    %222 = arith.addf %218, %221 : vector<16x32xf32>
    %c52 = arith.constant 52 : index
    %c0_100 = arith.constant 0 : index
    %223 = vector.load %arg4[%c52, %c0_100] : memref<64x32xf32, #tpu.memory_space<vmem>>, vector<1x32xf32>
    %224 = vector.broadcast %223 : vector<1x32xf32> to vector<16x32xf32>
    %225 = arith.mulf %3, %224 : vector<16x32xf32>
    %c53 = arith.constant 53 : index
    %c0_101 = arith.constant 0 : index
    %226 = vector.load %arg4[%c53, %c0_101] : memref<64x32xf32, #tpu.memory_space<vmem>>, vector<1x32xf32>
    %227 = vector.broadcast %226 : vector<1x32xf32> to vector<16x32xf32>
    %228 = arith.mulf %6, %227 : vector<16x32xf32>
    %229 = arith.addf %225, %228 : vector<16x32xf32>
    %c54 = arith.constant 54 : index
    %c0_102 = arith.constant 0 : index
    %230 = vector.load %arg4[%c54, %c0_102] : memref<64x32xf32, #tpu.memory_space<vmem>>, vector<1x32xf32>
    %231 = vector.broadcast %230 : vector<1x32xf32> to vector<16x32xf32>
    %232 = arith.mulf %9, %231 : vector<16x32xf32>
    %233 = arith.addf %229, %232 : vector<16x32xf32>
    %c55 = arith.constant 55 : index
    %c0_103 = arith.constant 0 : index
    %234 = vector.load %arg4[%c55, %c0_103] : memref<64x32xf32, #tpu.memory_space<vmem>>, vector<1x32xf32>
    %235 = vector.broadcast %234 : vector<1x32xf32> to vector<16x32xf32>
    %236 = arith.mulf %12, %235 : vector<16x32xf32>
    %237 = arith.addf %233, %236 : vector<16x32xf32>
    %238 = tpu.concatenate %222, %237 in 1 : vector<16x32xf32>, vector<16x32xf32> -> vector<16x64xf32>
    %c5_104 = arith.constant 5 : index
    %c0_105 = arith.constant 0 : index
    %239 = vector.load %arg5[%c5_104, %c0_105] : memref<8x64xf32, #tpu.memory_space<vmem>>, vector<1x64xf32>
    %240 = vector.broadcast %239 : vector<1x64xf32> to vector<16x64xf32>
    %241 = arith.addf %238, %240 : vector<16x64xf32>
    %cst_106 = arith.constant 0.000000e+00 : f32
    %242 = vector.broadcast %cst_106 : f32 to vector<16x64xf32>
    %243 = arith.maximumf %241, %242 : vector<16x64xf32>
    %c0_107 = arith.constant 0 : index
    %c5_108 = arith.constant 5 : index
    %c0_109 = arith.constant 0 : index
    %c0_110 = arith.constant 0 : index
    %244 = vector.load %arg6[%c0_107, %c5_108, %c0_109, %c0_110] : memref<1x8x16x64xf32, #tpu.memory_space<vmem>>, vector<1x1x16x64xf32>
    %245 = vector.shape_cast %244 : vector<1x1x16x64xf32> to vector<16x64xf32>
    %246 = vector.shape_cast %243 : vector<16x64xf32> to vector<1x1x16x64xf32>
    tpu.vector_store %arg6[%c0_107, %c5_108, %c0_109, %c0_110], %246 {strides = array<i32>} : memref<1x8x16x64xf32, #tpu.memory_space<vmem>>, vector<1x1x16x64xf32>,
    %c24 = arith.constant 24 : index
    %c0_111 = arith.constant 0 : index
    %247 = vector.load %arg4[%c24, %c0_111] : memref<64x32xf32, #tpu.memory_space<vmem>>, vector<1x32xf32>
    %248 = vector.broadcast %247 : vector<1x32xf32> to vector<16x32xf32>
    %249 = arith.mulf %3, %248 : vector<16x32xf32>
    %c25 = arith.constant 25 : index
    %c0_112 = arith.constant 0 : index
    %250 = vector.load %arg4[%c25, %c0_112] : memref<64x32xf32, #tpu.memory_space<vmem>>, vector<1x32xf32>
    %251 = vector.broadcast %250 : vector<1x32xf32> to vector<16x32xf32>
    %252 = arith.mulf %6, %251 : vector<16x32xf32>
    %253 = arith.addf %249, %252 : vector<16x32xf32>
    %c26 = arith.constant 26 : index
    %c0_113 = arith.constant 0 : index
    %254 = vector.load %arg4[%c26, %c0_113] : memref<64x32xf32, #tpu.memory_space<vmem>>, vector<1x32xf32>
    %255 = vector.broadcast %254 : vector<1x32xf32> to vector<16x32xf32>
    %256 = arith.mulf %9, %255 : vector<16x32xf32>
    %257 = arith.addf %253, %256 : vector<16x32xf32>
    %c27 = arith.constant 27 : index
    %c0_114 = arith.constant 0 : index
    %258 = vector.load %arg4[%c27, %c0_114] : memref<64x32xf32, #tpu.memory_space<vmem>>, vector<1x32xf32>
    %259 = vector.broadcast %258 : vector<1x32xf32> to vector<16x32xf32>
    %260 = arith.mulf %12, %259 : vector<16x32xf32>
    %261 = arith.addf %257, %260 : vector<16x32xf32>
    %c56 = arith.constant 56 : index
    %c0_115 = arith.constant 0 : index
    %262 = vector.load %arg4[%c56, %c0_115] : memref<64x32xf32, #tpu.memory_space<vmem>>, vector<1x32xf32>
    %263 = vector.broadcast %262 : vector<1x32xf32> to vector<16x32xf32>
    %264 = arith.mulf %3, %263 : vector<16x32xf32>
    %c57 = arith.constant 57 : index
    %c0_116 = arith.constant 0 : index
    %265 = vector.load %arg4[%c57, %c0_116] : memref<64x32xf32, #tpu.memory_space<vmem>>, vector<1x32xf32>
    %266 = vector.broadcast %265 : vector<1x32xf32> to vector<16x32xf32>
    %267 = arith.mulf %6, %266 : vector<16x32xf32>
    %268 = arith.addf %264, %267 : vector<16x32xf32>
    %c58 = arith.constant 58 : index
    %c0_117 = arith.constant 0 : index
    %269 = vector.load %arg4[%c58, %c0_117] : memref<64x32xf32, #tpu.memory_space<vmem>>, vector<1x32xf32>
    %270 = vector.broadcast %269 : vector<1x32xf32> to vector<16x32xf32>
    %271 = arith.mulf %9, %270 : vector<16x32xf32>
    %272 = arith.addf %268, %271 : vector<16x32xf32>
    %c59 = arith.constant 59 : index
    %c0_118 = arith.constant 0 : index
    %273 = vector.load %arg4[%c59, %c0_118] : memref<64x32xf32, #tpu.memory_space<vmem>>, vector<1x32xf32>
    %274 = vector.broadcast %273 : vector<1x32xf32> to vector<16x32xf32>
    %275 = arith.mulf %12, %274 : vector<16x32xf32>
    %276 = arith.addf %272, %275 : vector<16x32xf32>
    %277 = tpu.concatenate %261, %276 in 1 : vector<16x32xf32>, vector<16x32xf32> -> vector<16x64xf32>
    %c6_119 = arith.constant 6 : index
    %c0_120 = arith.constant 0 : index
    %278 = vector.load %arg5[%c6_119, %c0_120] : memref<8x64xf32, #tpu.memory_space<vmem>>, vector<1x64xf32>
    %279 = vector.broadcast %278 : vector<1x64xf32> to vector<16x64xf32>
    %280 = arith.addf %277, %279 : vector<16x64xf32>
    %cst_121 = arith.constant 0.000000e+00 : f32
    %281 = vector.broadcast %cst_121 : f32 to vector<16x64xf32>
    %282 = arith.maximumf %280, %281 : vector<16x64xf32>
    %c0_122 = arith.constant 0 : index
    %c6_123 = arith.constant 6 : index
    %c0_124 = arith.constant 0 : index
    %c0_125 = arith.constant 0 : index
    %283 = vector.load %arg6[%c0_122, %c6_123, %c0_124, %c0_125] : memref<1x8x16x64xf32, #tpu.memory_space<vmem>>, vector<1x1x16x64xf32>
    %284 = vector.shape_cast %283 : vector<1x1x16x64xf32> to vector<16x64xf32>
    %285 = vector.shape_cast %282 : vector<16x64xf32> to vector<1x1x16x64xf32>
    tpu.vector_store %arg6[%c0_122, %c6_123, %c0_124, %c0_125], %285 {strides = array<i32>} : memref<1x8x16x64xf32, #tpu.memory_space<vmem>>, vector<1x1x16x64xf32>,
    %c28 = arith.constant 28 : index
    %c0_126 = arith.constant 0 : index
    %286 = vector.load %arg4[%c28, %c0_126] : memref<64x32xf32, #tpu.memory_space<vmem>>, vector<1x32xf32>
    %287 = vector.broadcast %286 : vector<1x32xf32> to vector<16x32xf32>
    %288 = arith.mulf %3, %287 : vector<16x32xf32>
    %c29 = arith.constant 29 : index
    %c0_127 = arith.constant 0 : index
    %289 = vector.load %arg4[%c29, %c0_127] : memref<64x32xf32, #tpu.memory_space<vmem>>, vector<1x32xf32>
    %290 = vector.broadcast %289 : vector<1x32xf32> to vector<16x32xf32>
    %291 = arith.mulf %6, %290 : vector<16x32xf32>
    %292 = arith.addf %288, %291 : vector<16x32xf32>
    %c30 = arith.constant 30 : index
    %c0_128 = arith.constant 0 : index
    %293 = vector.load %arg4[%c30, %c0_128] : memref<64x32xf32, #tpu.memory_space<vmem>>, vector<1x32xf32>
    %294 = vector.broadcast %293 : vector<1x32xf32> to vector<16x32xf32>
    %295 = arith.mulf %9, %294 : vector<16x32xf32>
    %296 = arith.addf %292, %295 : vector<16x32xf32>
    %c31 = arith.constant 31 : index
    %c0_129 = arith.constant 0 : index
    %297 = vector.load %arg4[%c31, %c0_129] : memref<64x32xf32, #tpu.memory_space<vmem>>, vector<1x32xf32>
    %298 = vector.broadcast %297 : vector<1x32xf32> to vector<16x32xf32>
    %299 = arith.mulf %12, %298 : vector<16x32xf32>
    %300 = arith.addf %296, %299 : vector<16x32xf32>
    %c60 = arith.constant 60 : index
    %c0_130 = arith.constant 0 : index
    %301 = vector.load %arg4[%c60, %c0_130] : memref<64x32xf32, #tpu.memory_space<vmem>>, vector<1x32xf32>
    %302 = vector.broadcast %301 : vector<1x32xf32> to vector<16x32xf32>
    %303 = arith.mulf %3, %302 : vector<16x32xf32>
    %c61 = arith.constant 61 : index
    %c0_131 = arith.constant 0 : index
    %304 = vector.load %arg4[%c61, %c0_131] : memref<64x32xf32, #tpu.memory_space<vmem>>, vector<1x32xf32>
    %305 = vector.broadcast %304 : vector<1x32xf32> to vector<16x32xf32>
    %306 = arith.mulf %6, %305 : vector<16x32xf32>
    %307 = arith.addf %303, %306 : vector<16x32xf32>
    %c62 = arith.constant 62 : index
    %c0_132 = arith.constant 0 : index
    %308 = vector.load %arg4[%c62, %c0_132] : memref<64x32xf32, #tpu.memory_space<vmem>>, vector<1x32xf32>
    %309 = vector.broadcast %308 : vector<1x32xf32> to vector<16x32xf32>
    %310 = arith.mulf %9, %309 : vector<16x32xf32>
    %311 = arith.addf %307, %310 : vector<16x32xf32>
    %c63 = arith.constant 63 : index
    %c0_133 = arith.constant 0 : index
    %312 = vector.load %arg4[%c63, %c0_133] : memref<64x32xf32, #tpu.memory_space<vmem>>, vector<1x32xf32>
    %313 = vector.broadcast %312 : vector<1x32xf32> to vector<16x32xf32>
    %314 = arith.mulf %12, %313 : vector<16x32xf32>
    %315 = arith.addf %311, %314 : vector<16x32xf32>
    %316 = tpu.concatenate %300, %315 in 1 : vector<16x32xf32>, vector<16x32xf32> -> vector<16x64xf32>
    %c7_134 = arith.constant 7 : index
    %c0_135 = arith.constant 0 : index
    %317 = vector.load %arg5[%c7_134, %c0_135] : memref<8x64xf32, #tpu.memory_space<vmem>>, vector<1x64xf32>
    %318 = vector.broadcast %317 : vector<1x64xf32> to vector<16x64xf32>
    %319 = arith.addf %316, %318 : vector<16x64xf32>
    %cst_136 = arith.constant 0.000000e+00 : f32
    %320 = vector.broadcast %cst_136 : f32 to vector<16x64xf32>
    %321 = arith.maximumf %319, %320 : vector<16x64xf32>
    %c0_137 = arith.constant 0 : index
    %c7_138 = arith.constant 7 : index
    %c0_139 = arith.constant 0 : index
    %c0_140 = arith.constant 0 : index
    %322 = vector.load %arg6[%c0_137, %c7_138, %c0_139, %c0_140] : memref<1x8x16x64xf32, #tpu.memory_space<vmem>>, vector<1x1x16x64xf32>
    %323 = vector.shape_cast %322 : vector<1x1x16x64xf32> to vector<16x64xf32>
    %324 = vector.shape_cast %321 : vector<16x64xf32> to vector<1x1x16x64xf32>
    tpu.vector_store %arg6[%c0_137, %c7_138, %c0_139, %c0_140], %324 {strides = array<i32>} : memref<1x8x16x64xf32, #tpu.memory_space<vmem>>, vector<1x1x16x64xf32>,
    return
  }
  func.func @transform_0(%arg0: i32, %arg1: i32) -> (i32, i32, i32, i32) {
    %c0_i32 = arith.constant 0 : i32
    %c0_i32_0 = arith.constant 0 : i32
    %c0_i32_1 = arith.constant 0 : i32
    return %arg0, %c0_i32, %arg1, %c0_i32_0 : i32, i32, i32, i32
  }
  func.func @transform_1(%arg0: i32, %arg1: i32) -> (i32, i32) {
    %c0_i32 = arith.constant 0 : i32
    %c0_i32_0 = arith.constant 0 : i32
    %c0_i32_1 = arith.constant 0 : i32
    return %c0_i32, %c0_i32_0 : i32, i32
  }
  func.func @transform_2(%arg0: i32, %arg1: i32) -> (i32, i32) {
    %c0_i32 = arith.constant 0 : i32
    %c0_i32_0 = arith.constant 0 : i32
    %c0_i32_1 = arith.constant 0 : i32
    return %c0_i32, %c0_i32_0 : i32, i32
  }
  func.func @transform_3(%arg0: i32, %arg1: i32) -> (i32, i32) {
    %c0_i32 = arith.constant 0 : i32
    %c0_i32_0 = arith.constant 0 : i32
    %c0_i32_1 = arith.constant 0 : i32
    return %c0_i32, %c0_i32_0 : i32, i32
  }
  func.func @transform_4(%arg0: i32, %arg1: i32) -> (i32, i32, i32, i32) {
    %c0_i32 = arith.constant 0 : i32
    %c0_i32_0 = arith.constant 0 : i32
    %c0_i32_1 = arith.constant 0 : i32
    return %arg0, %c0_i32, %arg1, %c0_i32_0 : i32, i32, i32, i32
  }
}

</mosaic_0001>

<bundles_post_ra>
// kernel: upscale_block_forward.1
= control target key start
LH: loop header
LB: loop body
LE: loop exit
PB: predicated region body
PF: predicated region fallthrough
CT: control target
= control target key end

     0   :  { %s1147_s15 = smov 0   ;;  %s1149_s16 = smov 0   ;;  %s1870_s0 = inlined_call_operand.vmem [shape: f32[2,4,16,16], index: 0, kind: input, shape index: {}]   ;;  %s1871_s1 = inlined_call_operand.vmem [shape: f32[16,32], index: 1, kind: input, shape index: {}]   ;;  %s1872_s2 = inlined_call_operand.vmem [shape: f32[64,32], index: 2, kind: input, shape index: {}]   ;;  %s1873_s3 = inlined_call_operand.vmem [shape: f32[8,64], index: 3, kind: input, shape index: {}]   ;;  %s1874_s4 = inlined_call_operand.vmem [shape: f32[2,8,16,64], index: 4, kind: output, shape index: {}]  }
   0x1   :  { %s1151_s17 = smov 0  }
   0x2 LB: > { %s26_s18 = sadd.s32 1, %s1115_s16  ;;  %p963_p0 = scmp.ge.s32.totalorder %s1119_s17, 1  ;;  %s1119_s17 = sphi %s1151_s17, %s14_s17   ;;  %s1115_s16 = sphi %s1149_s16, %s1876_s16   ;;  %s1111_s15 = sphi %s1147_s15, %s1875_s15  }
   0x3   : > { %p28_p1 = scmp.ge.s32.totalorder %s26_s18, 2  ;;  %p183_p2 = scmp.lt.s32.totalorder %s1119_s17, 3 }
   0x5   : > { %s1878_s18 = smov (%p28_p1, %s26_s18), 0  ;;  %p184_p3 = pnand %p963_p0, %p183_p2 }
   0x6   : > { %p218_p4 = scmp.lt.s32.totalorder (!%p184_p3), %s1111_s15, 1  ;;  %s1121_s19 = smov (!%p184_p3), 32  }
   0x7   : > { %187 = sbr.rel (%p184_p3) target bundleno = 317 (0x13d), region = 36 }
   0xc   : > { %v238_v0 = vld [vmem:[%s1871_s1 + $0x8] sm:$0xff]  ;;  %v237_v1 = vld [vmem:[%s1871_s1] sm:$0xff]  ;;  %s1880_s15 = smov (!%p218_p4, %s1111_s15), 1  ;;  %vm241_vm0 = vcmask 130048   ;;  %v1218_v16 = vld [vmem:[%s1872_s2 + $0x30] ss:$0 sm:$0xff] }
   0xd   : > { %326 = vmatpush.msra.mxu2 %v238_v0  ;;  %358 = vmatpush.msra.mxu3 %v238_v0  ;;  %s998_s23 = sshll.u32 %s1880_s15, 6  ;;  %v1188_v10 = vld [vmem:[%s1872_s2 + $0x28] ss:$0 sm:$0xff]  ;;  %v1193_v11 = vld [vmem:[%s1872_s2 + $0x29] ss:$0 sm:$0xff]  ;;  %vm419_vm1 = vcmask 261120  }
   0xe   : > { %262 = vmatpush.msra.mxu0 %v238_v0  ;;  %294 = vmatpush.msra.mxu1 %v238_v0  ;;  %s225_s26 = scalar_lea.vmem %s1870_s0, %s998_s23  ;;  %v1198_v12 = vld [vmem:[%s1872_s2 + $0x24] ss:$0 sm:$0xff]  ;;  %v1203_v13 = vld [vmem:[%s1872_s2 + $0x25] ss:$0 sm:$0xff]  ;;  %v1208_v14 = vld [vmem:[%s1872_s2 + $0x20] ss:$0 sm:$0xff] }
   0xf   : > { %327 = vmatpush.msra.mxu2 %v237_v1  ;;  %359 = vmatpush.msra.mxu3 %v237_v1  ;;  %v974_v2 = vld [vmem:[%s225_s26 + $0x20] sm:$0xff]  ;;  %v978_v3 = vld [vmem:[%s225_s26 + $0x30] sm:$0xff]  ;;  %v975_v6 = vld [vmem:[%s225_s26 + $0x28] sm:$0xff]  ;;  %s999_s28 = sshll.u32 %s1880_s15, 7  ;;  %vm428_vm2 = vcmask 523264  }
  0x10   : > { %263 = vmatpush.msra.mxu0 %v237_v1  ;;  %295 = vmatpush.msra.mxu1 %v237_v1  ;;  %v239_v4 = vld [vmem:[%s225_s26] sm:$0xff]  ;;  %v970_v5 = vld [vmem:[%s225_s26 + $0x10] sm:$0xff]  ;;  %v979_v7 = vld [vmem:[%s225_s26 + $0x38] sm:$0xff]  ;;  %s1772_s5 = scalar_lea.vmem %s1874_s4, %s999_s28 }
  0x11   : > { %976 = vmatmul.msk.f32.vlgmr.msra.gmra.mxu2 %vm241_vm0, %v974_v2  ;;  %980 = vmatmul.msk.f32.vlgmr.msra.gmra.mxu3 %vm241_vm0, %v978_v3  ;;  %v240_v8 = vld [vmem:[%s225_s26 + $0x8] sm:$0xff]  ;;  %v971_v9 = vld [vmem:[%s225_s26 + $0x18] sm:$0xff]  ;;  %v1213_v15 = vld [vmem:[%s1872_s2 + $0x21] ss:$0 sm:$0xff] }
  0x12   : > { %968 = vmatmul.msk.f32.vlgmr.msra.gmra.mxu0 %vm241_vm0, %v239_v4  ;;  %972 = vmatmul.msk.f32.vlgmr.msra.gmra.mxu1 %vm241_vm0, %v970_v5  ;;  %v1223_v17 = vld [vmem:[%s1872_s2 + $0x31] ss:$0 sm:$0xff]  ;;  %v1228_v18 = vld [vmem:[%s1872_s2 + $0x34] ss:$0 sm:$0xff]  ;;  %v1233_v19 = vld [vmem:[%s1872_s2 + $0x35] ss:$0 sm:$0xff] }
  0x13   : > { %v1242_v22 = vld [vmem:[%s1872_s2 + $0x2a] ss:$0 sm:$0xff]  ;;  %v1247_v23 = vld [vmem:[%s1872_s2 + $0x26] ss:$0 sm:$0xff]  ;;  %v1252_v24 = vld [vmem:[%s1872_s2 + $0x2c] ss:$0 sm:$0xff] }
  0x14   : > { %v1265_v29 = vld [vmem:[%s1872_s2 + $0x2d] ss:$0 sm:$0xff]  ;;  %v1270_v30 = vld [vmem:[%s1872_s2 + $0x38] ss:$0 sm:$0xff]  ;;  %v1275_v31 = vld [vmem:[%s1872_s2 + $0x39] ss:$0 sm:$0xff] }
  0x15   : > { %v1280_v32 = vld [vmem:[%s1872_s2 + $0x2b] ss:$0 sm:$0xff]  ;;  %v1285_v33 = vld [vmem:[%s1872_s2 + $0x27] ss:$0 sm:$0xff]  ;;  %v1294_v36 = vld [vmem:[%s1872_s2 + $0x22] ss:$0 sm:$0xff] }
  0x16   : > { %v1303_v40 = vld [vmem:[%s1872_s2 + $0x23] ss:$0 sm:$0xff]  ;;  %v1308_v41 = vld [vmem:[%s1872_s2 + $0x32] ss:$0 sm:$0xff]  ;;  %v1313_v42 = vld [vmem:[%s1872_s2 + $0x33] ss:$0 sm:$0xff] }
  0x17   : > { %v1322_v48 = vld [vmem:[%s1872_s2 + $0x36] ss:$0 sm:$0xff]  ;;  %v1327_v49 = vld [vmem:[%s1872_s2 + $0x37] ss:$0 sm:$0xff]  ;;  %v1340_v55 = vld [vmem:[%s1872_s2 + $0x2e] ss:$0 sm:$0xff] }
  0x18   : > { %v1048_v62 = vld [vmem:[%s1872_s2 + $0x2f] ss:$0 sm:$0xff]  ;;  %v1368_v3 = vld [vmem:[%s1872_s2 + $0x3c] ss:$0 sm:$0xff] }
  0x19   : > { %977 = vmatmul.msk.f32.gmra.mxu2 %vm241_vm0, %v975_v6  ;;  %981 = vmatmul.msk.f32.gmra.mxu3 %vm241_vm0, %v979_v7 }
  0x1a   : > { %969 = vmatmul.msk.f32.gmra.mxu0 %vm241_vm0, %v240_v8  ;;  %973 = vmatmul.msk.f32.gmra.mxu1 %vm241_vm0, %v971_v9  ;;  %v1377_v8 = vld [vmem:[%s1872_s2 + $0x3a] ss:$0 sm:$0xff] }
  0x8f   : > { %v1235_v20 = vpop.f32.mrf.mxu0  ;;  %v1237_v21 = vpop.f32.mrf.mxu1 }
  0x90   : > { %v518_v25 = vmul.f32 %v1188_v10, %v1235_v20  ;;  %v522_v26 = vmul.f32 %v1193_v11, %v1237_v21  ;;  %v455_v27 = vmul.f32 %v1198_v12, %v1235_v20  ;;  %v459_v28 = vmul.f32 %v1203_v13, %v1237_v21 }
  0x91   : > { %v391_v34 = vmul.f32 %v1208_v14, %v1235_v20  ;;  %v395_v35 = vmul.f32 %v1213_v15, %v1237_v21  ;;  %v644_v37 = vmul.f32 %v1218_v16, %v1235_v20  ;;  %v648_v38 = vmul.f32 %v1223_v17, %v1237_v21 }
  0x92   : > { %v524_v39 = vadd.f32 %v522_v26, %v518_v25  ;;  %v707_v43 = vmul.f32 %v1228_v18, %v1235_v20  ;;  %v711_v44 = vmul.f32 %v1233_v19, %v1237_v21  ;;  %v461_v45 = vadd.f32 %v459_v28, %v455_v27  ;;  %v1384_v28 = vld [vmem:[%s1872_s2 + $0x3b] ss:$0 sm:$0xff] }
  0x93   : > { %v397_v46 = vadd.f32 %v395_v35, %v391_v34  ;;  %v650_v47 = vadd.f32 %v648_v38, %v644_v37  ;;  %v581_v50 = vmul.f32 %v1252_v24, %v1235_v20  ;;  %v585_v54 = vmul.f32 %v1265_v29, %v1237_v21 }
  0x94   : > { %v1331_v51 = vpop.f32.mrf.mxu2  ;;  %v1333_v52 = vpop.f32.mrf.mxu3  ;;  %v713_v53 = vadd.f32 %v711_v44, %v707_v43  ;;  %v770_v56 = vmul.f32 %v1270_v30, %v1235_v20  ;;  %v774_v57 = vmul.f32 %v1275_v31, %v1237_v21 }
  0x95   : > { %v528_v58 = vmul.f32 %v1242_v22, %v1331_v51  ;;  %v534_v59 = vmul.f32 %v1280_v32, %v1333_v52  ;;  %v465_v60 = vmul.f32 %v1247_v23, %v1331_v51  ;;  %v471_v61 = vmul.f32 %v1285_v33, %v1333_v52 }
  0x96   : > { %v401_v63 = vmul.f32 %v1294_v36, %v1331_v51  ;;  %v407_v0 = vmul.f32 %v1303_v40, %v1333_v52  ;;  %v654_v1 = vmul.f32 %v1308_v41, %v1331_v51  ;;  %v660_v2 = vmul.f32 %v1313_v42, %v1333_v52 }
  0x97   : > { %v530_v4 = vadd.f32 %v528_v58, %v524_v39  ;;  %v467_v5 = vadd.f32 %v465_v60, %v461_v45  ;;  %v717_v6 = vmul.f32 %v1322_v48, %v1331_v51  ;;  %v723_v7 = vmul.f32 %v1327_v49, %v1333_v52  ;;  %v1386_v37 = vpop.f32.mrf.mxu0  ;;  %v1388_v38 = vpop.f32.mrf.mxu1 }
  0x98   : > { %v403_v9 = vadd.f32 %v401_v63, %v397_v46  ;;  %v656_v25 = vadd.f32 %v654_v1, %v650_v47  ;;  %v587_v26 = vadd.f32 %v585_v54, %v581_v50  ;;  %v591_v27 = vmul.f32 %v1340_v55, %v1331_v51 }
  0x99   : > { %v536_v34 = vadd.f32 %v534_v59, %v530_v4  ;;  %v473_v35 = vadd.f32 %v471_v61, %v467_v5  ;;  %v719_v39 = vadd.f32 %v717_v6, %v713_v53  ;;  %v597_v43 = vmul.f32 %v1048_v62, %v1333_v52 }
  0x9a   : > { %v409_v44 = vadd.f32 %v407_v0, %v403_v9  ;;  %v593_v45 = vadd.f32 %v591_v27, %v587_v26  ;;  %v776_v46 = vadd.f32 %v774_v57, %v770_v56  ;;  %v833_v47 = vmul.f32 %v1368_v3, %v1235_v20  ;;  %v1055_v26 = vld [vmem:[%s1872_s2 + $0x3e] ss:$0 sm:$0xff] }
  0x9b   : > { %540 = vrot.lane.b32.xlu2 %v536_v34, %s1121_s19  ;;  %477 = vrot.lane.b32.xlu1 %v473_v35, %s1121_s19  ;;  %v662_v50 = vadd.f32 %v660_v2, %v656_v25  ;;  %v725_v54 = vadd.f32 %v723_v7, %v719_v39  ;;  %v780_v58 = vmul.f32 %v1377_v8, %v1331_v51 }
  0x9c   : > { %413 = vrot.lane.b32.xlu0 %v409_v44, %s1121_s19  ;;  %v1398_v53 = vpop.f32.mrf.mxu2  ;;  %v1400_v59 = vpop.f32.mrf.mxu3  ;;  %v786_v56 = vmul.f32 %v1384_v28, %v1333_v52  ;;  %v519_v57 = vmul.f32 %v1188_v10, %v1386_v37  ;;  %v523_v60 = vmul.f32 %v1193_v11, %v1388_v38  ;;  %v456_v61 = vmul.f32 %v1198_v12, %v1386_v37 }
  0x9d   : > { %v599_v63 = vadd.f32 %v597_v43, %v593_v45  ;;  %v782_v0 = vadd.f32 %v780_v58, %v776_v46  ;;  %v529_v1 = vmul.f32 %v1242_v22, %v1398_v53  ;;  %v460_v2 = vmul.f32 %v1203_v13, %v1388_v38 }
  0x9e   : > { %v525_v4 = vadd.f32 %v523_v60, %v519_v57  ;;  %v535_v5 = vmul.f32 %v1280_v32, %v1400_v59  ;;  %v466_v10 = vmul.f32 %v1247_v23, %v1398_v53  ;;  %v708_v11 = vmul.f32 %v1228_v18, %v1386_v37  ;;  %v1054_v18 = vld [vmem:[%s1872_s2 + $0x3d] ss:$0 sm:$0xff] }
  0x9f   : > { %v462_v6 = vadd.f32 %v460_v2, %v456_v61  ;;  %v472_v12 = vmul.f32 %v1285_v33, %v1400_v59  ;;  %v712_v22 = vmul.f32 %v1233_v19, %v1388_v38  ;;  %v718_v13 = vmul.f32 %v1322_v48, %v1398_v53  ;;  %v1057_v2 = vld [vmem:[%s1872_s2 + $0x8] ss:$0 sm:$0xff] }
  0xa0   : > { %v788_v7 = vadd.f32 %v786_v56, %v782_v0  ;;  %v531_v9 = vadd.f32 %v529_v1, %v525_v4  ;;  %v582_v32 = vmul.f32 %v1252_v24, %v1386_v37  ;;  %v586_v23 = vmul.f32 %v1265_v29, %v1388_v38  ;;  %v1496_v4 = vld [vmem:[%s1872_s2 + $0x10] ss:$0 sm:$0xff] }
  0xa1   : > { %v468_v25 = vadd.f32 %v466_v10, %v462_v6  ;;  %v714_v33 = vadd.f32 %v712_v22, %v708_v11  ;;  %v724_v19 = vmul.f32 %v1327_v49, %v1400_v59  ;;  %v592_v48 = vmul.f32 %v1340_v55, %v1398_v53  ;;  %v1056_v49 = vld [vmem:[%s1872_s2 + $0x3f] ss:$0 sm:$0xff]  ;;  %v1509_v6 = vld [vmem:[%s1872_s2 + $0x12] ss:$0 sm:$0xff] }
  0xa2   : > { %v588_v24 = vadd.f32 %v586_v23, %v582_v32  ;;  %v598_v27 = vmul.f32 %v1048_v62, %v1400_v59  ;;  %v392_v29 = vmul.f32 %v1208_v14, %v1386_v37  ;;  %v396_v34 = vmul.f32 %v1213_v15, %v1388_v38 }
  0xa3   : > { %666 = vrot.lane.b32.xlu2 %v662_v50, %s1121_s19  ;;  %729 = vrot.lane.b32.xlu1 %v725_v54, %s1121_s19  ;;  %v537_v55 = vadd.f32 %v535_v5, %v531_v9  ;;  %v720_v35 = vadd.f32 %v718_v13, %v714_v33  ;;  %v402_v39 = vmul.f32 %v1294_v36, %v1398_v53  ;;  %v1528_v33 = vld [vmem:[%s1872_s2 + $0x5] ss:$0 sm:$0xff] }
  0xa4   : > { %603 = vrot.lane.b32.xlu0 %v599_v63, %s1121_s19  ;;  %v474_v62 = vadd.f32 %v472_v12, %v468_v25  ;;  %v594_v14 = vadd.f32 %v592_v48, %v588_v24  ;;  %v398_v43 = vadd.f32 %v396_v34, %v392_v29  ;;  %v837_v15 = vmul.f32 %v1054_v18, %v1237_v21  ;;  %v1514_v12 = vld [vmem:[%s1872_s2 + $0x13] ss:$0 sm:$0xff]  ;;  %v1548_v29 = vld [vmem:[%s1872_s2 + $0x7] ss:$0 sm:$0xff]  ;;  %v1553_v34 = vld [vmem:[%s1872_s2 + $0x1] ss:$0 sm:$0xff] }
  0xa5   : > { %v1454_v44 = vadd.f32 %v724_v19, %v720_v35  ;;  %v408_v45 = vmul.f32 %v1303_v40, %v1400_v59  ;;  %v843_v46 = vmul.f32 %v1055_v26, %v1331_v51  ;;  %v771_v50 = vmul.f32 %v1270_v30, %v1386_v37  ;;  %v1533_v19 = vld [vmem:[%s1872_s2 + $0x6] ss:$0 sm:$0xff] }
  0xa6   : > { %v404_v54 = vadd.f32 %v402_v39, %v398_v43  ;;  %v839_v58 = vadd.f32 %v837_v15, %v833_v47  ;;  %v849_v36 = vmul.f32 %v1056_v49, %v1333_v52  ;;  %v775_v56 = vmul.f32 %v1275_v31, %v1388_v38  ;;  %v1058_v31 = vld [vmem:[%s1872_s2 + $0x9] ss:$0 sm:$0xff] }
  0xa7   : > { %v1464_v57 = vadd.f32 %v598_v27, %v594_v14  ;;  %v781_v60 = vmul.f32 %v1377_v8, %v1398_v53  ;;  %v645_v40 = vmul.f32 %v1218_v16, %v1386_v37  ;;  %v649_v61 = vmul.f32 %v1223_v17, %v1388_v38  ;;  %v1059_v8 = vld [vmem:[%s1872_s2 + $0xa] ss:$0 sm:$0xff]  ;;  %v1060_v16 = vld [vmem:[%s1872_s2 + $0xb] ss:$0 sm:$0xff]  ;;  %v1543_v27 = vld [vmem:[%s1872_s2 + $0x4] ss:$0 sm:$0xff] }
  0xa8   : > { %v845_v63 = vadd.f32 %v843_v46, %v839_v58  ;;  %v777_v30 = vadd.f32 %v775_v56, %v771_v50  ;;  %v787_v47 = vmul.f32 %v1384_v28, %v1400_v59  ;;  %v655_v0 = vmul.f32 %v1308_v41, %v1398_v53  ;;  %v1570_v14 = vld [vmem:[%s1872_s2 + $0x3] ss:$0 sm:$0xff]  ;;  %v1579_v50 = vld [vmem:[%s1872_s2] ss:$0 sm:$0xff] }
  0xa9   : > { %v651_v17 = vadd.f32 %v649_v61, %v645_v40  ;;  %v661_v1 = vmul.f32 %v1313_v42, %v1400_v59  ;;  %v834_v28 = vmul.f32 %v1368_v3, %v1386_v37  ;;  %v838_v41 = vmul.f32 %v1054_v18, %v1388_v38  ;;  %v1504_v3 = vld [vmem:[%s1872_s2 + $0x11] ss:$0 sm:$0xff] }
  0xaa   : > { %v410_v5 = vadd.f32 %v408_v45, %v404_v54  ;;  %v1498_v10 = vadd.f32 %v849_v36, %v845_v63  ;;  %v783_v11 = vadd.f32 %v781_v60, %v777_v30  ;;  %v844_v42 = vmul.f32 %v1055_v26, %v1398_v53 }
  0xab   : > { %542 = vrot.lane.b32.xlu2 %v537_v55, %s1121_s19  ;;  %479 = vrot.lane.b32.xlu1 %v474_v62, %s1121_s19  ;;  %v657_v22 = vadd.f32 %v655_v0, %v651_v17  ;;  %v840_v13 = vadd.f32 %v838_v41, %v834_v28  ;;  %v850_v9 = vmul.f32 %v1056_v49, %v1400_v59  ;;  %v1565_v62 = vld [vmem:[%s1872_s2 + $0x2] ss:$0 sm:$0xff]  ;;  %v1079_v41 = vld [vmem:[%s1872_s2 + $0x16] ss:$0 sm:$0xff] }
  0xac   : > { %792 = vrot.lane.b32.xlu0 %v788_v7, %s1121_s19  ;;  %v1520_v32 = vadd.f32 %v787_v47, %v783_v11  ;;  %v500_v23 = vmul.f32 %v1058_v31, %v1237_v21  ;;  %v506_v18 = vmul.f32 %v1059_v8, %v1331_v51  ;;  %v512_v25 = vmul.f32 %v1060_v16, %v1333_v52 }
  0xad   : > { %v1535_v48 = vadd.f32 %v661_v1, %v657_v22  ;;  %v846_v7 = vadd.f32 %v844_v42, %v840_v13  ;;  %v496_v26 = vmul.f32 %v1057_v2, %v1235_v20  ;;  %v622_v24 = vmul.f32 %v1496_v4, %v1235_v20  ;;  %v1082_v22 = vld [vmem:[%s1872_s2 + $0xc] ss:$0 sm:$0xff]  ;;  %v1083_v13 = vld [vmem:[%s1872_s2 + $0xd] ss:$0 sm:$0xff] }
  0xae   : > { %v626_v49 = vmul.f32 %v1504_v3, %v1237_v21  ;;  %v632_v55 = vmul.f32 %v1509_v6, %v1331_v51  ;;  %v638_v35 = vmul.f32 %v1514_v12, %v1333_v52  ;;  %v501_v39 = vmul.f32 %v1058_v31, %v1388_v38 }
  0xaf   : > { %v1572_v43 = vadd.f32 %v850_v9, %v846_v7  ;;  %v502_v15 = vadd.f32 %v500_v23, %v496_v26  ;;  %v507_v45 = vmul.f32 %v1059_v8, %v1398_v53  ;;  %v513_v46 = vmul.f32 %v1060_v16, %v1400_v59  ;;  %v1077_v8 = vld [vmem:[%s1872_s2 + $0x14] ss:$0 sm:$0xff]  ;;  %v1078_v16 = vld [vmem:[%s1872_s2 + $0x15] ss:$0 sm:$0xff]  ;;  %v1085_v7 = vld [vmem:[%s1872_s2 + $0xf] ss:$0 sm:$0xff] }
  0xb0   : > { %v628_v54 = vadd.f32 %v626_v49, %v622_v24  ;;  %v497_v58 = vmul.f32 %v1057_v2, %v1386_v37  ;;  %v437_v36 = vmul.f32 %v1528_v33, %v1237_v21  ;;  %v443_v56 = vmul.f32 %v1533_v19, %v1331_v51  ;;  %v1080_v2 = vld [vmem:[%s1872_s2 + $0x17] ss:$0 sm:$0xff]  ;;  %v1638_v26 = vld [vmem:[%s1872_s2 + $0x1c] ss:$0 sm:$0xff] }
  0xb1   : > { %v508_v60 = vadd.f32 %v506_v18, %v502_v15  ;;  %v449_v40 = vmul.f32 %v1548_v29, %v1333_v52  ;;  %v433_v61 = vmul.f32 %v1543_v27, %v1235_v20  ;;  %v373_v63 = vmul.f32 %v1553_v34, %v1237_v21 }
  0xb2   : > { %v634_v30 = vadd.f32 %v632_v55, %v628_v54  ;;  %v503_v47 = vadd.f32 %v501_v39, %v497_v58  ;;  %v379_v0 = vmul.f32 %v1565_v62, %v1331_v51  ;;  %v385_v31 = vmul.f32 %v1570_v14, %v1333_v52  ;;  %v1647_v39 = vld [vmem:[%s1872_s2 + $0x1d] ss:$0 sm:$0xff] }
  0xb3   : > { %731 = vrot.lane.b32.xlu2 %v1454_v44, %s1121_s19  ;;  %605 = vrot.lane.b32.xlu1 %v1464_v57, %s1121_s19  ;;  %v1606_v17 = vadd.f32 %v512_v25, %v508_v60  ;;  %v439_v1 = vadd.f32 %v437_v36, %v433_v61  ;;  %v369_v28 = vmul.f32 %v1579_v50, %v1235_v20  ;;  %v1084_v25 = vld [vmem:[%s1872_s2 + $0xe] ss:$0 sm:$0xff]  ;;  %v1661_v36 = vld [vmem:[%s1872_s2 + $0x1f] ss:$0 sm:$0xff] }
  0xb4   : > { %415 = vrot.lane.b32.xlu0 %v410_v5, %s1121_s19  ;;  %v1617_v44 = vadd.f32 %v638_v35, %v634_v30  ;;  %v509_v11 = vadd.f32 %v507_v45, %v503_v47  ;;  %v686_v57 = vmul.f32 %v1077_v8, %v1386_v37  ;;  %v690_v42 = vmul.f32 %v1078_v16, %v1388_v38  ;;  %v1093_v30 = vld [vmem:[%s1872_s2 + $0x19] ss:$0 sm:$0xff] }
  0xb5   : > { %v445_v9 = vadd.f32 %v443_v56, %v439_v1  ;;  %v375_v23 = vadd.f32 %v373_v63, %v369_v28  ;;  %v696_v18 = vmul.f32 %v1079_v41, %v1398_v53  ;;  %v702_v5 = vmul.f32 %v1080_v2, %v1400_v59  ;;  %v1092_v56 = vld [vmem:[%s1872_s2 + $0x18] ss:$0 sm:$0xff]  ;;  %v1094_v1 = vld [vmem:[%s1872_s2 + $0x1a] ss:$0 sm:$0xff]  ;;  %v1095_v28 = vld [vmem:[%s1872_s2 + $0x1b] ss:$0 sm:$0xff] }
  0xb6   : > { %v1640_v24 = vadd.f32 %v513_v46, %v509_v11  ;;  %v692_v49 = vadd.f32 %v690_v42, %v686_v57  ;;  %v685_v55 = vmul.f32 %v1077_v8, %v1235_v20  ;;  %v689_v35 = vmul.f32 %v1078_v16, %v1237_v21  ;;  %v1656_v46 = vld [vmem:[%s1872_s2 + $0x1e] ss:$0 sm:$0xff] }
  0xb7   : > { %v1649_v15 = vadd.f32 %v449_v40, %v445_v9  ;;  %v381_v45 = vadd.f32 %v379_v0, %v375_v23  ;;  %v695_v54 = vmul.f32 %v1079_v41, %v1331_v51  ;;  %v701_v58 = vmul.f32 %v1080_v2, %v1333_v52 }
  0xb8   : > { %v698_v60 = vadd.f32 %v696_v18, %v692_v49  ;;  %v691_v40 = vadd.f32 %v689_v35, %v685_v55  ;;  %v559_v61 = vmul.f32 %v1082_v22, %v1235_v20  ;;  %v563_v63 = vmul.f32 %v1083_v13, %v1237_v21 }
  0xb9   : > { %v1671_v47 = vadd.f32 %v385_v31, %v381_v45  ;;  %v569_v0 = vmul.f32 %v1084_v25, %v1331_v51  ;;  %v575_v8 = vmul.f32 %v1085_v7, %v1333_v52  ;;  %v811_v16 = vmul.f32 %v1638_v26, %v1235_v20 }
  0xba   : > { %v1683_v41 = vadd.f32 %v702_v5, %v698_v60  ;;  %v697_v2 = vadd.f32 %v695_v54, %v691_v40  ;;  %v565_v31 = vadd.f32 %v563_v63, %v559_v61  ;;  %v815_v11 = vmul.f32 %v1647_v39, %v1237_v21 }
  0xbb   : > { %855 = vrot.lane.b32.xlu2 %v1498_v10, %s1121_s19  ;;  %794 = vrot.lane.b32.xlu1 %v1520_v32, %s1121_s19  ;;  %v821_v57 = vmul.f32 %v1656_v46, %v1331_v51  ;;  %v827_v42 = vmul.f32 %v1661_v36, %v1333_v52  ;;  %v748_v9 = vmul.f32 %v1092_v56, %v1235_v20 }
  0xbc   : > { %668 = vrot.lane.b32.xlu0 %v1535_v48, %s1121_s19  ;;  %v1698_v23 = vadd.f32 %v701_v58, %v697_v2  ;;  %v571_v18 = vadd.f32 %v569_v0, %v565_v31  ;;  %v817_v5 = vadd.f32 %v815_v11, %v811_v16  ;;  %v752_v10 = vmul.f32 %v1093_v30, %v1237_v21 }
  0xbd   : > { %v758_v49 = vmul.f32 %v1094_v1, %v1331_v51  ;;  %v764_v32 = vmul.f32 %v1095_v28, %v1333_v52  ;;  %v438_v55 = vmul.f32 %v1528_v33, %v1388_v38  ;;  %v444_v35 = vmul.f32 %v1533_v19, %v1398_v53 }
  0xbe   : > { %v1707_v20 = vadd.f32 %v575_v8, %v571_v18  ;;  %v823_v45 = vadd.f32 %v821_v57, %v817_v5  ;;  %v754_v48 = vadd.f32 %v752_v10, %v748_v9  ;;  %v450_v54 = vmul.f32 %v1548_v29, %v1400_v59 }
  0xbf   : > { %v434_v21 = vmul.f32 %v1543_v27, %v1386_v37  ;;  %v560_v51 = vmul.f32 %v1082_v22, %v1386_v37  ;;  %v564_v52 = vmul.f32 %v1083_v13, %v1388_v38  ;;  %v570_v58 = vmul.f32 %v1084_v25, %v1398_v53 }
  0xc0   : > { %v1716_v33 = vadd.f32 %v827_v42, %v823_v45  ;;  %v760_v60 = vadd.f32 %v758_v49, %v754_v48  ;;  %v576_v19 = vmul.f32 %v1085_v7, %v1400_v59  ;;  %v374_v40 = vmul.f32 %v1553_v34, %v1388_v38 }
  0xc1   : > { %v440_v61 = vadd.f32 %v438_v55, %v434_v21  ;;  %v566_v63 = vadd.f32 %v564_v52, %v560_v51  ;;  %v380_v29 = vmul.f32 %v1565_v62, %v1398_v53  ;;  %v386_v27 = vmul.f32 %v1570_v14, %v1400_v59  ;;  %v1076_v21 = vld [vmem:[%s1873_s3] ss:$0 sm:$0xff] }
  0xc2   : > { %v1725_v22 = vadd.f32 %v764_v32, %v760_v60  ;;  %v370_v13 = vmul.f32 %v1579_v50, %v1386_v37  ;;  %v749_v25 = vmul.f32 %v1092_v56, %v1386_v37  ;;  %v753_v7 = vmul.f32 %v1093_v30, %v1388_v38 }
  0xc3   : > { %v446_v0 = vadd.f32 %v444_v35, %v440_v61  ;;  %v572_v8 = vadd.f32 %v570_v58, %v566_v63  ;;  %v759_v34 = vmul.f32 %v1094_v1, %v1398_v53  ;;  %v765_v16 = vmul.f32 %v1095_v28, %v1400_v59 }
  0xc4   : > { %857 = vrot.lane.b32.xlu0 %v1572_v43, %s1121_s19  ;;  %v376_v62 = vadd.f32 %v374_v40, %v370_v13  ;;  %v755_v14 = vadd.f32 %v753_v7, %v749_v25  ;;  %v623_v2 = vmul.f32 %v1496_v4, %v1386_v37  ;;  %v627_v50 = vmul.f32 %v1504_v3, %v1388_v38  ;;  %v1091_v25 = vld [vmem:[%s1873_s3 + $0x7] ss:$0 sm:$0xff] }
  0xc5   : > { %v1739_v56 = vadd.f32 %v450_v54, %v446_v0  ;;  %v1741_v30 = vadd.f32 %v576_v19, %v572_v8  ;;  %v633_v1 = vmul.f32 %v1509_v6, %v1398_v53  ;;  %v639_v28 = vmul.f32 %v1514_v12, %v1400_v59  ;;  %v1071_v54 = vld [vmem:[%s1873_s3 + $0x1] ss:$0 sm:$0xff] }
  0xc6   : > { %v382_v31 = vadd.f32 %v380_v29, %v376_v62  ;;  %v761_v43 = vadd.f32 %v759_v34, %v755_v14  ;;  %v629_v11 = vadd.f32 %v627_v50, %v623_v2  ;;  %v812_v4 = vmul.f32 %v1638_v26, %v1386_v37  ;;  %v1061_v37 = vld [vmem:[%s1873_s3 + $0x2] ss:$0 sm:$0xff] }
  0xc7   : > { %v816_v3 = vmul.f32 %v1647_v39, %v1388_v38  ;;  %v822_v57 = vmul.f32 %v1656_v46, %v1398_v53  ;;  %v828_v12 = vmul.f32 %v1661_v36, %v1400_v59  ;;  %v1779_v39 = vld [vmem:[%s1873_s3 + $0x4] ss:$0 sm:$0xff] }
  0xc8   : > { %v1753_v42 = vadd.f32 %v386_v27, %v382_v31  ;;  %v1755_v9 = vadd.f32 %v765_v16, %v761_v43  ;;  %v635_v6 = vadd.f32 %v633_v1, %v629_v11 }
  0xc9   : > { %v818_v18 = vadd.f32 %v816_v3, %v812_v4 }
  0xca   : > { %v1759_v5 = vadd.f32 %v639_v28, %v635_v6 }
  0xcb   : > { %v824_v10 = vadd.f32 %v822_v57, %v818_v18 }
  0xcd   : > { %v1761_v49 = vadd.f32 %v828_v12, %v824_v10 }
  0xf5   : > { %v541_v38 = vpop.permute.xlu2 %540 }
  0xf6   : > { %v546_v53 = vsel %vm419_vm1, %v1606_v17, %v541_v38 }
  0xf7   : > { %v550_v26 = vadd.f32 %v1061_v37, %v546_v53 }
  0xf9   : > { %v552_v59 = vmax.f32 %v550_v26, 0.0 }
  0xfb   : > { %984 = vst.msk [vmem:[%s1772_s5 + $0x20] sm:$0xff] %vm428_vm2, %v552_v59 }
  0xfd   : > { %v667_v46 = vpop.permute.xlu2 %666 }
  0xfe   : > { %v672_v17 = vsel %vm419_vm1, %v1617_v44, %v667_v46  ;;  %v1081_v44 = vld [vmem:[%s1873_s3 + $0x5] ss:$0 sm:$0xff] }
  0xff   : > { %v676_v36 = vadd.f32 %v1779_v39, %v672_v17 }
 0x101   : > { %v678_v32 = vmax.f32 %v676_v36, 0.0 }
 0x103   : > { %988 = vst.msk [vmem:[%s1772_s5 + $0x40] sm:$0xff] %vm428_vm2, %v678_v32 }
 0x105   : > { %v543_v55 = vpop.permute.xlu2 %542 }
 0x106   : > { %v547_v35 = vsel %vm419_vm1, %v1640_v24, %v543_v55 }
 0x107   : > { %v551_v45 = vadd.f32 %v1061_v37, %v547_v35 }
 0x109   : > { %v553_v48 = vmax.f32 %v551_v45, 0.0 }
 0x10b   : > { %985 = vst.msk [vmem:[%s1772_s5 + $0x28] sm:$0xff] %vm428_vm2, %v553_v48 }
 0x10d   : > { %v478_v51 = vpop.permute.xlu1 %477  ;;  %v732_v24 = vpop.permute.xlu2 %731 }
 0x10e   : > { %v483_v52 = vsel %vm419_vm1, %v1649_v15, %v478_v51  ;;  %v414_v58 = vpop.permute.xlu0 %413  ;;  %v736_v60 = vsel %vm419_vm1, %v1683_v41, %v732_v24  ;;  %v1086_v15 = vld [vmem:[%s1873_s3 + $0x3] ss:$0 sm:$0xff] }
 0x10f   : > { %v487_v19 = vadd.f32 %v1071_v54, %v483_v52  ;;  %v420_v40 = vsel %vm419_vm1, %v1671_v47, %v414_v58  ;;  %v740_v61 = vadd.f32 %v1081_v44, %v736_v60 }
 0x110   : > { %v424_v63 = vadd.f32 %v1076_v21, %v420_v40 }
 0x111   : > { %v489_v29 = vmax.f32 %v487_v19, 0.0  ;;  %v742_v27 = vmax.f32 %v740_v61, 0.0 }
 0x112   : > { %v426_v13 = vmax.f32 %v424_v63, 0.0 }
 0x113   : > { %982 = vst.msk [vmem:[%s1772_s5 + $0x10] sm:$0xff] %vm428_vm2, %v489_v29 }
 0x114   : > { %429 = vst.msk [vmem:[%s1772_s5] sm:$0xff] %vm428_vm2, %v426_v13 }
 0x115   : > { %991 = vst.msk [vmem:[%s1772_s5 + $0x58] sm:$0xff] %vm428_vm2, %v742_v27  ;;  %v730_v47 = vpop.permute.xlu1 %729  ;;  %v856_v41 = vpop.permute.xlu2 %855 }
 0x116   : > { %v735_v7 = vsel %vm419_vm1, %v1698_v23, %v730_v47  ;;  %v604_v0 = vpop.permute.xlu0 %603  ;;  %v861_v8 = vsel %vm419_vm1, %v1716_v33, %v856_v41  ;;  %v1096_v23 = vld [vmem:[%s1873_s3 + $0x6] ss:$0 sm:$0xff] }
 0x117   : > { %v739_v34 = vadd.f32 %v1081_v44, %v735_v7  ;;  %v609_v16 = vsel %vm419_vm1, %v1707_v20, %v604_v0  ;;  %v865_v62 = vadd.f32 %v1091_v25, %v861_v8 }
 0x118   : > { %v613_v14 = vadd.f32 %v1086_v15, %v609_v16 }
 0x119   : > { %v741_v2 = vmax.f32 %v739_v34, 0.0  ;;  %v867_v50 = vmax.f32 %v865_v62, 0.0 }
 0x11a   : > { %v615_v1 = vmax.f32 %v613_v14, 0.0 }
 0x11b   : > { %990 = vst.msk [vmem:[%s1772_s5 + $0x50] sm:$0xff] %vm428_vm2, %v741_v2 }
 0x11c   : > { %986 = vst.msk [vmem:[%s1772_s5 + $0x30] sm:$0xff] %vm428_vm2, %v615_v1 }
 0x11d   : > { %994 = vst.msk [vmem:[%s1772_s5 + $0x70] sm:$0xff] %vm428_vm2, %v867_v50  ;;  %v480_v33 = vpop.permute.xlu1 %479 }
 0x11e   : > { %v793_v28 = vpop.permute.xlu0 %792  ;;  %v484_v20 = vsel %vm419_vm1, %v1739_v56, %v480_v33 }
 0x11f   : > { %v798_v31 = vsel %vm419_vm1, %v1725_v22, %v793_v28  ;;  %v488_v43 = vadd.f32 %v1071_v54, %v484_v20 }
 0x120   : > { %v802_v11 = vadd.f32 %v1096_v23, %v798_v31 }
 0x121   : > { %v490_v4 = vmax.f32 %v488_v43, 0.0 }
 0x122   : > { %v804_v3 = vmax.f32 %v802_v11, 0.0 }
 0x123   : > { %983 = vst.msk [vmem:[%s1772_s5 + $0x18] sm:$0xff] %vm428_vm2, %v490_v4 }
 0x124   : > { %992 = vst.msk [vmem:[%s1772_s5 + $0x60] sm:$0xff] %vm428_vm2, %v804_v3 }
 0x125   : > { %v606_v57 = vpop.permute.xlu1 %605 }
 0x126   : > { %v610_v6 = vsel %vm419_vm1, %v1741_v30, %v606_v57  ;;  %v416_v18 = vpop.permute.xlu0 %415 }
 0x127   : > { %v614_v56 = vadd.f32 %v1086_v15, %v610_v6  ;;  %v421_v22 = vsel %vm419_vm1, %v1753_v42, %v416_v18 }
 0x128   : > { %v425_v12 = vadd.f32 %v1076_v21, %v421_v22 }
 0x129   : > { %v616_v10 = vmax.f32 %v614_v56, 0.0 }
 0x12a   : > { %v427_v37 = vmax.f32 %v425_v12, 0.0 }
 0x12b   : > { %987 = vst.msk [vmem:[%s1772_s5 + $0x38] sm:$0xff] %vm428_vm2, %v616_v10 }
 0x12c   : > { %430 = vst.msk [vmem:[%s1772_s5 + $0x8] sm:$0xff] %vm428_vm2, %v427_v37 }
 0x12d   : > { %v795_v38 = vpop.permute.xlu1 %794 }
 0x12e   : > { %v799_v53 = vsel %vm419_vm1, %v1755_v9, %v795_v38  ;;  %v669_v30 = vpop.permute.xlu0 %668 }
 0x12f   : > { %v803_v26 = vadd.f32 %v1096_v23, %v799_v53  ;;  %v673_v59 = vsel %vm419_vm1, %v1759_v5, %v669_v30 }
 0x130   : > { %v677_v46 = vadd.f32 %v1779_v39, %v673_v59 }
 0x131   : > { %v805_v42 = vmax.f32 %v803_v26, 0.0 }
 0x132   : > { %v679_v17 = vmax.f32 %v677_v46, 0.0 }
 0x133   : > { %993 = vst.msk [vmem:[%s1772_s5 + $0x68] sm:$0xff] %vm428_vm2, %v805_v42 }
 0x134   : > { %989 = vst.msk [vmem:[%s1772_s5 + $0x48] sm:$0xff] %vm428_vm2, %v679_v17 }
 0x136   : > { %v858_v36 = vpop.permute.xlu0 %857 }
 0x137   : > { %v862_v32 = vsel %vm419_vm1, %v1761_v49, %v858_v36 }
 0x138   : > { %v866_v55 = vadd.f32 %v1091_v25, %v862_v32 }
 0x13a   : > { %v868_v35 = vmax.f32 %v866_v55, 0.0 }
 0x13c   : > { %995 = vst.msk [vmem:[%s1772_s5 + $0x78] sm:$0xff] %vm428_vm2, %v868_v35 }
 0x13d PF: > { %s14_s17 = sadd.s32 1, %s1119_s17   ;;  %s1875_s15 = smov %s1115_s16 }
 0x13e   : > { %p11_p5 = scmp.ge.s32.totalorder %s14_s17, 4   ;;  %s1876_s16 = smov %s1878_s18 }
 0x140   :  { %13 = sbr.rel (!%p11_p5) target bundleno = 2 (0x2), region = 76 }

</bundles_post_ra>
